<compile_context>
chip_gen: v6e
topology: v6e:2x2x1
jax: 0.10.0
libtpu: 0.0.40
codegen_flags: <defaults>
</compile_context>

<pallas_src>
import math

import numpy as np
import jax
import jax.numpy as jnp
from jax.experimental import pallas as pl
from jax.experimental.pallas import tpu as pltpu


# ------------------------------------------------------------------ kernel --
def data_embedding_kernel(xfused_ref, pe_ref, w_ref, o_ref):
    # xfused_ref: (TB, TL, K)        pre-shifted values ++ time features
    # pe_ref    : (TL, d_model)      positional encoding with both biases folded in
    # w_ref     : (K, d_model)       fused conv-as-matmul + temporal weight
    # o_ref     : (TB, TL, d_model)
    pe = pe_ref[...]          # hoisted: reused by every unrolled batch row
    w = w_ref[...]
    for b in range(o_ref.shape[0]):   # TB is a small static constant -> unrolled 2-D dots
        acc = jnp.dot(xfused_ref[b], w, preferred_element_type=jnp.float32)
        o_ref[b] = (acc + pe).astype(o_ref.dtype)


# ----------------------------------------------------------- pe construction --
def _positional_encoding(L, d_model):
    """Sin/cos PE table (matches the PyTorch layout)."""
    position = jnp.arange(L, dtype=jnp.float32)[:, None]
    div_term = jnp.exp(jnp.arange(0, d_model, 2, dtype=jnp.float32)
                       * (-(math.log(10000.0) / d_model)))
    sin_part = jnp.sin(position * div_term)          # (L, ceil(d/2))
    cos_part = jnp.cos(position * div_term)          # (L, ceil(d/2))
    pe = jnp.zeros((L, d_model), dtype=jnp.float32)
    pe = pe.at[:, 0::2].set(sin_part)
    pe = pe.at[:, 1::2].set(cos_part[:, : d_model // 2])
    return pe


# ----------------------------------------------------------------- wrapper --
def data_embedding(x, x_mark, w_conv, b_conv, w_time, b_time,
                   max_len=5000, out_dtype=jnp.float32,
                   tl_max=1024, target_rows=1024):
    """x: (B, L, c_in) f32, x_mark: (B, L, d_mark) f32.
    w_conv: (d_model, c_in, 3) PyTorch Conv1d weight layout.
    w_time: (d_model, d_mark) PyTorch Linear weight layout.
    Returns (B, L, d_model) in `out_dtype` (float32 by default to match the PyTorch module;
    pass jnp.bfloat16 to halve the dominant HBM write stream when downstream tolerates it).
    v7x note: tl_max/target_rows may be raised to 2048 (add vmem_limit_bytes headroom)."""
    B, L, c_in = x.shape
    d_model = w_conv.shape[0]
    d_mark = x_mark.shape[-1]
    assert w_conv.shape == (d_model, c_in, 3), w_conv.shape
    assert w_time.shape == (d_model, d_mark), (w_time.shape, d_mark)
    assert L <= max_len
    assert tl_max % 8 == 0, "tl_max must be a multiple of 8 (sublane tiling)"

    # --- glue: circular shift + concat (conv-as-matmul) fused with x_mark ---
    x_m1 = jnp.roll(x, shift=1, axis=1)    # x[(t-1) % L]
    x_p1 = jnp.roll(x, shift=-1, axis=1)   # x[(t+1) % L]
    x_fused = jnp.concatenate([x_m1, x, x_p1, x_mark], axis=-1)  # (B, L, K)
    K = 3 * c_in + d_mark

    # Conv weight (d_model, c_in, 3) -> (3*c_in, d_model), rows ordered [shift k, channel c]
    # to match x_fused; temporal Linear stacked below.
    w_conv_mat = jnp.transpose(w_conv, (2, 1, 0)).reshape(3 * c_in, d_model)
    w_time_mat = jnp.transpose(w_time, (1, 0))                   # (d_mark, d_model)
    w_fused = jnp.concatenate([w_conv_mat, w_time_mat], axis=0)  # (K, d_model)

    # Positional encoding with both biases folded in (one add in-kernel).
    pe_bias = _positional_encoding(L, d_model) + (b_conv + b_time)[None, :]  # (L, d_model)

    # --- tiling ---------------------------------------------------------------
    # Common case L <= tl_max: one full-L tile per block, pack TB sequences per block so each
    # grid step carries ~target_rows rows (amortizes per-step pipeline overhead).
    # Long case L > tl_max: tile L with TL = tl_max (multiple of 8), TB = 1.
    if L <= tl_max:
        TL = L                                               # full dim -> no (8) constraint
        TB = max(1, min(B, target_rows // max(TL, 1), 32))   # cap unroll at 32
        while B % TB:                                        # keep batch blocks exact
            TB -= 1
    else:
        TL = tl_max
        TB = 1
    n_l = pl.cdiv(L, TL)          # partial last L-tile handled by Pallas edge padding
    n_b = B // TB
    # Batch axis innermost -> pe block index constant across consecutive steps -> DMA skipped.
    grid = (n_l, n_b)

    out_itemsize = np.dtype(out_dtype).itemsize
    cost = pl.CostEstimate(
        flops=2 * B * L * K * d_model,
        transcendentals=0,
        bytes_accessed=int(x_fused.size * 4 + pe_bias.size * 4 + w_fused.size * 4
                           + B * L * d_model * out_itemsize),
    )

    out = pl.pallas_call(
        data_embedding_kernel,
        out_shape=jax.ShapeDtypeStruct((B, L, d_model), out_dtype),
        grid_spec=pltpu.PrefetchScalarGridSpec(
            num_scalar_prefetch=0,
            grid=grid,
            in_specs=[
                pl.BlockSpec((TB, TL, K),        lambda l, b: (b, l, 0)),
                pl.BlockSpec((TL, d_model),      lambda l, b: (l, 0)),   # b-invariant -> reused
                pl.BlockSpec((K, d_model),       lambda l, b: (0, 0)),   # fetched once
            ],
            out_specs=pl.BlockSpec((TB, TL, d_model), lambda l, b: (b, l, 0)),
        ),
        compiler_params=pltpu.CompilerParams(
            dimension_semantics=("parallel", "parallel")),
        cost_estimate=cost,
    )(x_fused, pe_bias, w_fused)
    # TODO(synk): nn.Dropout(p=0.1) is identity in eval mode; not applied here.
    return out


# -------------------------------------------------------------- reference --
def data_embedding_ref(x, x_mark, w_conv, b_conv, w_time, b_time):
    B, L, c_in = x.shape
    d_model = w_conv.shape[0]
    # circular conv1d, k=3, pad=1
    xp = jnp.concatenate([x[:, -1:, :], x, x[:, :1, :]], axis=1)  # (B, L+2, c_in)
    conv = jnp.zeros((B, L, d_model), jnp.float32)
    for k in range(3):
        conv = conv + jnp.einsum('blc,oc->blo', xp[:, k:k + L, :], w_conv[:, :, k])
    conv = conv + b_conv[None, None, :]
    temp = jnp.einsum('blc,oc->blo', x_mark, w_time) + b_time[None, None, :]
    pe = _positional_encoding(L, d_model)
    return conv + temp + pe[None]


# ------------------------------------------------------------------- main --
if __name__ == "__main__":
    def make_params(key, c_in, d_model, d_mark=4):
        k3, k4, k5, k6 = jax.random.split(key, 4)
        # Conv1d(c_in -> d_model, k=3): kaiming_normal_(fan_in, leaky_relu)
        fan_in = c_in * 3
        gain = math.sqrt(2.0 / (1.0 + 0.01 ** 2))
        w_conv = jax.random.normal(k3, (d_model, c_in, 3), dtype=jnp.float32) \
            * (gain / math.sqrt(fan_in))
        b_conv = (jax.random.uniform(k4, (d_model,), dtype=jnp.float32) - 0.5) \
            * (2.0 / math.sqrt(fan_in))
        # Linear(d_mark -> d_model)
        bound = 1.0 / math.sqrt(d_mark)
        w_time = (jax.random.uniform(k5, (d_model, d_mark), dtype=jnp.float32)
                  - 0.5) * 2 * bound
        b_time = (jax.random.uniform(k6, (d_model,), dtype=jnp.float32)
                  - 0.5) * 2 * bound
        return w_conv, b_conv, w_time, b_time

    def check(out, ref, atol, rtol, name):
        assert out.shape == ref.shape, (name, out.shape, ref.shape)
        o32 = out.astype(jnp.float32)
        err = jnp.max(jnp.abs(o32 - ref))
        assert jnp.allclose(o32, ref, atol=atol, rtol=rtol), f"{name}: max err {err}"

    key = jax.random.PRNGKey(0)
    k1, k2, k3, k4, k5, k6, kp1, kp2, kp3 = jax.random.split(key, 9)

    # 1) small-shape check (single tile, TB=2)
    B, L, c_in, d_model = 2, 16, 4, 32
    x = jax.random.normal(k1, (B, L, c_in), dtype=jnp.float32)
    xm = jax.random.normal(k2, (B, L, 4), dtype=jnp.float32)
    p = make_params(kp1, c_in, d_model)
    out = jax.block_until_ready(data_embedding(x, xm, *p))
    check(out, data_embedding_ref(x, xm, *p), 1e-5, 1e-5, "small")

    # 2) typical pyraformer shape: batch packing (TB=4), lane-dense d_model
    B, L, c_in, d_model = 4, 96, 7, 128
    x = jax.random.normal(k3, (B, L, c_in), dtype=jnp.float32)
    xm = jax.random.normal(k4, (B, L, 4), dtype=jnp.float32)
    p = make_params(kp2, c_in, d_model)
    out = jax.block_until_ready(data_embedding(x, xm, *p))
    check(out, data_embedding_ref(x, xm, *p), 1e-5, 1e-5, "packed")

    # 2b) bf16 output path (halves the dominant HBM write stream)
    out_bf16 = jax.block_until_ready(
        data_embedding(x, xm, *p, out_dtype=jnp.bfloat16))
    check(out_bf16, data_embedding_ref(x, xm, *p), 5e-2, 5e-2, "bf16")

    # 3) L-tiling path with a partial last L-tile and pe reuse across inner batch axis
    #    (TL=64 -> grid=(cdiv(200,64)=4, 2))
    B, L, c_in, d_model = 2, 200, 5, 64
    x = jax.random.normal(k5, (B, L, c_in), dtype=jnp.float32)
    xm = jax.random.normal(k6, (B, L, 4), dtype=jnp.float32)
    p = make_params(kp3, c_in, d_model)
    out = jax.block_until_ready(
        data_embedding(x, xm, *p, tl_max=64, target_rows=64))
    check(out, data_embedding_ref(x, xm, *p), 1e-5, 1e-5, "tiled-L")

    print("KERNEL_OK")
</pallas_src>

<mosaic_0001>
module attributes {stable_mosaic.version = 11 : i64} {
  func.func @data_embedding_kernel(%arg0: i32, %arg1: i32, %arg2: memref<2x16x16xf32, #tpu.memory_space<vmem>>, %arg3: memref<16x32xf32, #tpu.memory_space<vmem>>, %arg4: memref<16x32xf32, #tpu.memory_space<vmem>>, %arg5: memref<2x16x32xf32, #tpu.memory_space<vmem>>) attributes {dimension_semantics = [#tpu.dimension_semantics<parallel>, #tpu.dimension_semantics<parallel>], iteration_bounds = array<i64: 1, 1>, scalar_prefetch = 0 : i64, scratch_operands = 0 : i64, tpu.core_type = #tpu.core_type<tc>, window_params = [{transform_indices = @transform_0, window_bounds = array<i64: 2, 16, 16>}, {transform_indices = @transform_1, window_bounds = array<i64: 16, 32>}, {pipeline_mode = #tpu.pipeline_mode<synchronous>, transform_indices = @transform_2, window_bounds = array<i64: 16, 32>}, {transform_indices = @transform_3, window_bounds = array<i64: 2, 16, 32>}]} {
    %c0 = arith.constant 0 : index
    %c0_0 = arith.constant 0 : index
    %0 = vector.load %arg3[%c0, %c0_0] : memref<16x32xf32, #tpu.memory_space<vmem>>, vector<16x32xf32>
    %c0_1 = arith.constant 0 : index
    %c0_2 = arith.constant 0 : index
    %1 = vector.load %arg4[%c0_1, %c0_2] : memref<16x32xf32, #tpu.memory_space<vmem>>, vector<16x32xf32>
    %c0_3 = arith.constant 0 : index
    %c0_4 = arith.constant 0 : index
    %c0_5 = arith.constant 0 : index
    %2 = vector.load %arg2[%c0_3, %c0_4, %c0_5] : memref<2x16x16xf32, #tpu.memory_space<vmem>>, vector<1x16x16xf32>
    %3 = vector.shape_cast %2 : vector<1x16x16xf32> to vector<16x16xf32>
    %cst = arith.constant dense<0.000000e+00> : vector<16x32xf32>
    %4 = tpu.matmul %3, %1, %cst {dimension_numbers = #tpu.dot_dimension_numbers<[1], [0], [0], [1], [0, 0, 1, 1], [], []>} : vector<16x16xf32>, vector<16x32xf32>, vector<16x32xf32> -> vector<16x32xf32>
    %5 = arith.addf %4, %0 : vector<16x32xf32>
    %c0_6 = arith.constant 0 : index
    %c0_7 = arith.constant 0 : index
    %c0_8 = arith.constant 0 : index
    %6 = vector.load %arg5[%c0_6, %c0_7, %c0_8] : memref<2x16x32xf32, #tpu.memory_space<vmem>>, vector<1x16x32xf32>
    %7 = vector.shape_cast %6 : vector<1x16x32xf32> to vector<16x32xf32>
    %8 = vector.shape_cast %5 : vector<16x32xf32> to vector<1x16x32xf32>
    tpu.vector_store %arg5[%c0_6, %c0_7, %c0_8], %8 {strides = array<i32>} : memref<2x16x32xf32, #tpu.memory_space<vmem>>, vector<1x16x32xf32>,
    %c1 = arith.constant 1 : index
    %c0_9 = arith.constant 0 : index
    %c0_10 = arith.constant 0 : index
    %9 = vector.load %arg2[%c1, %c0_9, %c0_10] : memref<2x16x16xf32, #tpu.memory_space<vmem>>, vector<1x16x16xf32>
    %10 = vector.shape_cast %9 : vector<1x16x16xf32> to vector<16x16xf32>
    %cst_11 = arith.constant dense<0.000000e+00> : vector<16x32xf32>
    %11 = tpu.matmul %10, %1, %cst_11 {dimension_numbers = #tpu.dot_dimension_numbers<[1], [0], [0], [1], [0, 0, 1, 1], [], []>} : vector<16x16xf32>, vector<16x32xf32>, vector<16x32xf32> -> vector<16x32xf32>
    %12 = arith.addf %11, %0 : vector<16x32xf32>
    %c1_12 = arith.constant 1 : index
    %c0_13 = arith.constant 0 : index
    %c0_14 = arith.constant 0 : index
    %13 = vector.load %arg5[%c1_12, %c0_13, %c0_14] : memref<2x16x32xf32, #tpu.memory_space<vmem>>, vector<1x16x32xf32>
    %14 = vector.shape_cast %13 : vector<1x16x32xf32> to vector<16x32xf32>
    %15 = vector.shape_cast %12 : vector<16x32xf32> to vector<1x16x32xf32>
    tpu.vector_store %arg5[%c1_12, %c0_13, %c0_14], %15 {strides = array<i32>} : memref<2x16x32xf32, #tpu.memory_space<vmem>>, vector<1x16x32xf32>,
    return
  }
  func.func @transform_0(%arg0: i32, %arg1: i32) -> (i32, i32, i32) {
    %c0_i32 = arith.constant 0 : i32
    %c0_i32_0 = arith.constant 0 : i32
    return %arg1, %arg0, %c0_i32 : i32, i32, i32
  }
  func.func @transform_1(%arg0: i32, %arg1: i32) -> (i32, i32) {
    %c0_i32 = arith.constant 0 : i32
    %c0_i32_0 = arith.constant 0 : i32
    return %arg0, %c0_i32 : i32, i32
  }
  func.func @transform_2(%arg0: i32, %arg1: i32) -> (i32, i32) {
    %c0_i32 = arith.constant 0 : i32
    %c0_i32_0 = arith.constant 0 : i32
    %c0_i32_1 = arith.constant 0 : i32
    return %c0_i32, %c0_i32_0 : i32, i32
  }
  func.func @transform_3(%arg0: i32, %arg1: i32) -> (i32, i32, i32) {
    %c0_i32 = arith.constant 0 : i32
    %c0_i32_0 = arith.constant 0 : i32
    return %arg1, %arg0, %c0_i32 : i32, i32, i32
  }
}

</mosaic_0001>

<bundles_post_ra>
// kernel: tpu_custom_call.1
= control target key start
LH: loop header
LB: loop body
LE: loop exit
PB: predicated region body
PF: predicated region fallthrough
CT: control target
= control target key end

     0   :  { %8 = vsyncpa [#allocation3], 0  ;;  %s420_s0 = inlined_call_operand.hbm [shape: f32[2,16,16], index: 0, kind: input, shape index: {}]   ;;  %s421_s1 = inlined_call_operand.hbm [shape: f32[16,32], index: 1, kind: input, shape index: {}]   ;;  %s422_s2 = inlined_call_operand.hbm [shape: f32[16,32], index: 2, kind: input, shape index: {}]   ;;  %s423_s3 = inlined_call_operand.hbm [shape: f32[2,16,32], index: 3, kind: output, shape index: {}]  }
   0x1   :  { %9 = vsyncpa [#allocation6], 0 }
   0x2   :  { %10 = vsyncpa [#allocation4], 0  ;;  %s370_s12 = smov [#allocation5]   ;;  %s371_s14 = smov [#allocation2]  }
   0x3   :  { %s28_s13 = sshll.u32 %s370_s12, 4  ;;  %s16_s15 = sshll.u32 %s371_s14, 4  ;;  %s29_s13 = int_to_ptr.vmem [resolvable:$true] %s28_s13  ;;  %s17_s15 = int_to_ptr.vmem [resolvable:$true] %s16_s15 }
   0x4   :  { %s292_s16 = scalar_lea.vmem %s29_s13, 256  ;;  %p297_p1 = scmp.lt.s32.totalorder %s29_s13, %s29_s13 }
   0x5   :  { %p293_p0 = scmp.ne.s32.totalorder %s29_s13, %s292_s16  ;;  %p298_p2 = scmp.lt.s32.totalorder %s292_s16, %s292_s16 }
   0x7   :  { %p299_p3 = por %p298_p2, %p297_p1 }
   0x9   :  { %p300_p4 = pnand %p299_p3, %p293_p0 }
   0xb   :  { %303 = shalt.err (!%p300_p4)
}
   0xc   :  { %s372_s17 = smov 128   ;;  %s373_s18 = smov 8  }
   0xd   :  { %34 = dma.hbm_to_vmem [thread:$0]  %s421_s1, 256, %s29_s13, [#allocation6], %s372_s17, %s372_s17, %s373_s18  }
   0xe   :  { %s312_s21 = scalar_lea.vmem %s17_s15, 512  ;;  %p317_p6 = scmp.lt.s32.totalorder %s17_s15, %s17_s15 }
   0xf   :  { %p313_p5 = scmp.ne.s32.totalorder %s17_s15, %s312_s21  ;;  %p318_p7 = scmp.lt.s32.totalorder %s312_s21, %s312_s21 }
  0x11   :  { %p319_p8 = por %p318_p7, %p317_p6 }
  0x13   :  { %p320_p9 = pnand %p319_p8, %p313_p5 }
  0x15   :  { %323 = shalt.err (!%p320_p9)
}
  0x16   :  { %22 = dma.hbm_to_vmem [thread:$0]  %s420_s0, 512, %s17_s15, [#allocation3], %s372_s17, %s372_s17, %s373_s18  }
  0x17   :  { %s374_s24 = smov [#allocation7]  }
  0x18   :  { %s40_s25 = sshll.u32 %s374_s24, 4  ;;  %s41_s25 = int_to_ptr.vmem [resolvable:$true] %s40_s25 }
  0x19   :  { %s332_s26 = scalar_lea.vmem %s41_s25, 256  ;;  %p337_p11 = scmp.lt.s32.totalorder %s41_s25, %s41_s25 }
  0x1a   :  { %p333_p10 = scmp.ne.s32.totalorder %s41_s25, %s332_s26  ;;  %p338_p12 = scmp.lt.s32.totalorder %s332_s26, %s332_s26 }
  0x1c   :  { %p339_p13 = por %p338_p12, %p337_p11 }
  0x1e   :  { %p340_p0 = pnand %p339_p13, %p333_p10 }
  0x20   :  { %343 = shalt.err (!%p340_p0)
}
  0x21   :  { %46 = dma.hbm_to_vmem [thread:$0]  %s422_s2, 256, %s41_s25, [#allocation6], %s372_s17, %s372_s17, %s373_s18  }
  0x22   :  { %364 = dma.done.wait [#allocation3], 512  }
  0x23   :  { %365 = vsyncadd [#allocation3], 4294966784 }
  0x24   :  { %366 = dma.done.wait [#allocation6], 512  }
  0x25   :  { %367 = vsyncadd [#allocation6], 4294966784  ;;  %v59_v0 = vld [vmem:[#allocation7 + $0x8] sm:$0xff]  ;;  %v58_v1 = vld [vmem:[#allocation7] sm:$0xff]  ;;  %vm62_vm0 = vcmask 130048   ;;  %vm144_vm1 = vcmask 261120  }
  0x26   :  { %264 = vmatprep.subr.mxu0 %v59_v0  ;;  %271 = vmatprep.subr.mxu1 %v59_v0  ;;  %v60_v2 = vld [vmem:[#allocation2] sm:$0xff]  ;;  %v148_v3 = vld [vmem:[#allocation2 + $0x10] sm:$0xff]  ;;  %v61_v4 = vld [vmem:[#allocation2 + $0x8] sm:$0xff]  ;;  %s375_s0 = smov [#allocation8]  }
  0x27   :  { %265 = vmatpush3.msra.mxu0 %v59_v0  ;;  %272 = vmatpush3.msra.mxu1 %v59_v0  ;;  %v149_v5 = vld [vmem:[#allocation2 + $0x18] sm:$0xff]  ;;  %v57_v6 = vld [vmem:[#allocation5 + $0x8] sm:$0xff]  ;;  %v56_v9 = vld [vmem:[#allocation5] sm:$0xff]  ;;  %s239_s2 = sshll.u32 %s375_s0, 4  ;;  %s240_s2 = int_to_ptr.vmem [resolvable:$true] %s239_s2 }
  0x28   :  { %266 = vmatprep.subr.mxu0 %v58_v1  ;;  %273 = vmatprep.subr.mxu1 %v58_v1  ;;  %s344_s28 = scalar_lea.vmem %s240_s2, 512  ;;  %p349_p2 = scmp.lt.s32.totalorder %s240_s2, %s240_s2 }
  0x29   :  { %267 = vmatpush3.msra.mxu0 %v58_v1  ;;  %268 = vmatprep.mubr.msk.f32.mxu0 %vm62_vm0, %v60_v2  ;;  %p345_p1 = scmp.ne.s32.totalorder %s240_s2, %s344_s28  ;;  %p350_p3 = scmp.lt.s32.totalorder %s344_s28, %s344_s28 }
  0x2a   :  { %274 = vmatpush3.msra.mxu1 %v58_v1  ;;  %275 = vmatprep.mubr.msk.f32.mxu1 %vm62_vm0, %v148_v3 }
  0x2b   :  { %269 = vmatmul.mubr.msk.f32.vlgmr.msra.gmra.mxu0 %vm62_vm0, %v61_v4  ;;  %276 = vmatmul.mubr.msk.f32.vlgmr.msra.gmra.mxu1 %vm62_vm0, %v149_v5  ;;  %p351_p4 = por %p350_p3, %p349_p2 }
  0x2d   :  { %p352_p5 = pnand %p351_p4, %p345_p1 }
  0xeb   :  { %v270_v7 = vpop.f32.mrf.mxu0  ;;  %v277_v8 = vpop.f32.mrf.mxu1 }
  0xec   :  { %v141_v10 = vadd.f32 %v270_v7, %v57_v6  ;;  %v228_v11 = vadd.f32 %v277_v8, %v57_v6 }
  0xed   :  { %v135_v12 = vpop.f32.mrf.mxu0  ;;  %v222_v13 = vpop.f32.mrf.mxu1 }
  0xee   :  { %146 = vst.msk [vmem:[#allocation8 + $0x8] sm:$0xff] %vm144_vm1, %v141_v10  ;;  %233 = vst.msk [vmem:[#allocation8 + $0x18] sm:$0xff] %vm144_vm1, %v228_v11  ;;  %v136_v14 = vadd.f32 %v135_v12, %v56_v9  ;;  %v223_v15 = vadd.f32 %v222_v13, %v56_v9 }
  0xf0   :  { %145 = vst.msk [vmem:[#allocation8] sm:$0xff] %vm144_vm1, %v136_v14  ;;  %232 = vst.msk [vmem:[#allocation8 + $0x10] sm:$0xff] %vm144_vm1, %v223_v15 }
  0xf1   :  { %355 = shalt.err (!%p352_p5)
}
  0xf2   :  { %245 = dma.vmem_to_hbm [thread:$0]  %s240_s2, 512, %s423_s3, [#allocation4], %s372_s17, %s372_s17, %s373_s18  }
  0xf3   :  { %368 = dma.done.wait [#allocation4], 512  }
  0xf4   :  { %369 = vsyncadd [#allocation4], 4294966784 }
  0xf5   :  { %249 = vsyncpa [#allocation3], 1 }
  0xf6   :  { %250 = vsyncpa [#allocation6], 1 }
  0xf7   :  { %251 = vsyncpa [#allocation4], 1 }

</bundles_post_ra>
